<compile_context>
chip_gen: v6e
topology: v6e:2x2x1
jax: 0.10.0
libtpu: 0.0.40
codegen_flags: <defaults>
</compile_context>

<pallas_src>
import jax
import jax.numpy as jnp
from jax.experimental import pallas as pl
from jax.experimental.pallas import tpu as pltpu

IMAGE_SIZE = 784
LAYER_DIMS = [IMAGE_SIZE, 128, 64, 10, 10, 10, 10]
NUM_CLASSES = LAYER_DIMS[-1]

PADDED_FEAT = 128        # every hidden / output feature dim padded to 128 lanes
ROW_ALIGN = 16           # bf16 native sublane tiling is (16, 128)
DEFAULT_TILE_B = 512     # 512-row tiles already hit ~85% of HBM roofline and
                         # leave room for >=2 grid steps (pipelining / megacore)


def _round_up(x, m):
    return ((x + m - 1) // m) * m


def _mlp_kernel(x_ref,
                w0_ref, b0_ref,
                w1_ref, b1_ref,
                w2_ref, b2_ref,
                w3_ref, b3_ref,
                w4_ref, b4_ref,
                w5_ref, b5_ref,
                o_ref):
    """One batch tile: 6 x (Linear + sigmoid) then masked log_softmax."""

    def layer(h, w_ref, b_ref):
        # bf16 x bf16 MXU matmul, f32 accumulation; sigmoid in f32 on the EUP
        # via the tanh identity sigmoid(z) = 0.5*(tanh(0.5*z)+1).
        z = jnp.dot(h.astype(jnp.bfloat16), w_ref[...],
                    preferred_element_type=jnp.float32)
        z = z + b_ref[...]                       # (TILE_B,128) + (1,128) f32
        return 0.5 * (jnp.tanh(0.5 * z) + 1.0)   # f32

    h = x_ref[...]                               # (TILE_B, 784) bf16
    h = layer(h, w0_ref, b0_ref)
    h = layer(h, w1_ref, b1_ref)
    h = layer(h, w2_ref, b2_ref)
    h = layer(h, w3_ref, b3_ref)
    h = layer(h, w4_ref, b4_ref)
    h = layer(h, w5_ref, b5_ref)                 # (TILE_B, 128) f32; cols>=10 are 0.5

    # log_softmax over the first NUM_CLASSES lanes only (padded lanes masked).
    lane_ids = jax.lax.broadcasted_iota(jnp.int32, (1, PADDED_FEAT), 1)
    valid = lane_ids < NUM_CLASSES               # (1,128), broadcasts below
    h_for_max = jnp.where(valid, h, jnp.float32(-1e30))
    m = jnp.max(h_for_max, axis=-1, keepdims=True)
    shifted = h - m
    exps = jnp.where(valid, jnp.exp(shifted), jnp.float32(0.0))
    lse = jnp.log(jnp.sum(exps, axis=-1, keepdims=True))
    out = shifted - lse
    # Lane-dense, unmasked (TILE_B, 128) bf16 store; padded lanes written as 0.
    o_ref[...] = jnp.where(valid, out, jnp.float32(0.0)).astype(o_ref.dtype)


def _prep_params(params):
    """Zero-pad feature dims to 128 lanes; weights -> bf16, biases stay f32."""
    prepped = []
    for idx, (w, b) in enumerate(params):
        fan_in, fan_out = w.shape
        in_target = fan_in if idx == 0 else PADDED_FEAT   # W0 keeps 784 rows
        w_p = jnp.pad(w.astype(jnp.float32),
                      ((0, in_target - fan_in), (0, PADDED_FEAT - fan_out)))
        w_p = w_p.astype(jnp.bfloat16)
        b_p = jnp.pad(jnp.reshape(b, (1, -1)).astype(jnp.float32),
                      ((0, 0), (0, PADDED_FEAT - fan_out)))
        prepped.append((w_p, b_p))
    return prepped


def _choose_tile(batch, tile_cap):
    """Pick (tile_b, padded_batch, num_tiles): >=2 tiles when possible, low waste."""
    aligned = _round_up(batch, ROW_ALIGN)
    num_tiles = max(pl.cdiv(aligned, tile_cap), 1)
    if aligned >= 2 * ROW_ALIGN:
        num_tiles = max(num_tiles, 2)            # v7x megacore + pipelining
    tb = _round_up(pl.cdiv(aligned, num_tiles), ROW_ALIGN)
    return tb, tb * num_tiles, num_tiles


def neural_net_f_forward(x, params, *, tile_b=DEFAULT_TILE_B):
    """x: any shape reshapeable to (-1, 784). params: list of (W:(in,out), b:(1,out))."""
    x2d = jnp.reshape(x, (-1, IMAGE_SIZE))
    batch = x2d.shape[0]
    x_bf = x2d.astype(jnp.bfloat16)              # halve the dominant HBM read

    tb, batch_padded, num_tiles = _choose_tile(batch, tile_b)
    if batch_padded != batch:
        x_bf = jnp.pad(x_bf, ((0, batch_padded - batch), (0, 0)))

    prepped = _prep_params(params)

    flat_args = [x_bf]
    # Raw 784-wide input block (full last dim, no lane padding needed).
    in_specs = [pl.BlockSpec((tb, IMAGE_SIZE), lambda i: (i, 0))]
    for (w_p, b_p) in prepped:
        flat_args.extend([w_p, b_p])
        in_specs.append(pl.BlockSpec(w_p.shape, lambda i: (0, 0)))   # VMEM-resident
        in_specs.append(pl.BlockSpec(b_p.shape, lambda i: (0, 0)))

    weight_bytes = sum(w.size * w.dtype.itemsize + b.size * b.dtype.itemsize
                       for (w, b) in prepped)
    cost = pl.CostEstimate(
        flops=2 * batch_padded * (IMAGE_SIZE * PADDED_FEAT
                                  + 5 * PADDED_FEAT * PADDED_FEAT),
        transcendentals=batch_padded * (6 * PADDED_FEAT + NUM_CLASSES + 1),
        bytes_accessed=batch_padded * IMAGE_SIZE * 2
                       + weight_bytes
                       + batch_padded * PADDED_FEAT * 2,
    )

    out = pl.pallas_call(
        _mlp_kernel,
        out_shape=jax.ShapeDtypeStruct((batch_padded, PADDED_FEAT), jnp.bfloat16),
        grid=(num_tiles,),
        in_specs=in_specs,
        out_specs=pl.BlockSpec((tb, PADDED_FEAT), lambda i: (i, 0)),
        compiler_params=pltpu.CompilerParams(
            dimension_semantics=("parallel",)),
        cost_estimate=cost,
    )(*flat_args)

    return out[:batch, :NUM_CLASSES].astype(jnp.float32)


neural_net_f = jax.jit(neural_net_f_forward, static_argnames=("tile_b",))


def init_params(key):
    """Deterministic init mimicking nn.Linear default (uniform +/- 1/sqrt(fan_in))."""
    params = []
    for i in range(len(LAYER_DIMS) - 1):
        fan_in, fan_out = LAYER_DIMS[i], LAYER_DIMS[i + 1]
        key, kw, kb = jax.random.split(key, 3)
        bound = 1.0 / (fan_in ** 0.5)
        w = jax.random.uniform(kw, (fan_in, fan_out), jnp.float32, -bound, bound)
        b = jax.random.uniform(kb, (1, fan_out), jnp.float32, -bound, bound)
        params.append((w, b))
    return params


if __name__ == "__main__":
    key = jax.random.PRNGKey(0)
    key, kx = jax.random.split(key)

    # Small MNIST-like batch: (B, 1, 28, 28) -> view(-1, 784) inside the wrapper.
    batch = 8
    x = jax.random.normal(kx, (batch, 1, 28, 28), jnp.float32)

    params = init_params(key)

    out = neural_net_f(x, params)
    out = jax.block_until_ready(out)

    # Reference computation in plain (unpadded, f32) JAX.
    h = jnp.reshape(x, (-1, IMAGE_SIZE))
    for (w, b) in params:
        h = jax.nn.sigmoid(h @ w + b)
    ref = jax.nn.log_softmax(h, axis=1)

    assert out.shape == (batch, NUM_CLASSES)
    # bf16 input/weights/output -> looser tolerance than the all-f32 path.
    assert jnp.max(jnp.abs(out - ref)) < 5e-2

    print("KERNEL_OK")
</pallas_src>

<mosaic_0001>
module attributes {stable_mosaic.version = 11 : i64} {
  func.func @_mlp_kernel(%arg0: i32, %arg1: memref<16x784xbf16, #tpu.memory_space<vmem>>, %arg2: memref<784x128xbf16, #tpu.memory_space<vmem>>, %arg3: memref<1x128xf32, #tpu.memory_space<vmem>>, %arg4: memref<128x128xbf16, #tpu.memory_space<vmem>>, %arg5: memref<1x128xf32, #tpu.memory_space<vmem>>, %arg6: memref<128x128xbf16, #tpu.memory_space<vmem>>, %arg7: memref<1x128xf32, #tpu.memory_space<vmem>>, %arg8: memref<128x128xbf16, #tpu.memory_space<vmem>>, %arg9: memref<1x128xf32, #tpu.memory_space<vmem>>, %arg10: memref<128x128xbf16, #tpu.memory_space<vmem>>, %arg11: memref<1x128xf32, #tpu.memory_space<vmem>>, %arg12: memref<128x128xbf16, #tpu.memory_space<vmem>>, %arg13: memref<1x128xf32, #tpu.memory_space<vmem>>, %arg14: memref<16x128xbf16, #tpu.memory_space<vmem>>) attributes {dimension_semantics = [#tpu.dimension_semantics<parallel>], iteration_bounds = array<i64: 1>, scalar_prefetch = 0 : i64, scratch_operands = 0 : i64, tpu.core_type = #tpu.core_type<tc>, window_params = [{transform_indices = @transform_0, window_bounds = array<i64: 16, 784>}, {pipeline_mode = #tpu.pipeline_mode<synchronous>, transform_indices = @transform_1, window_bounds = array<i64: 784, 128>}, {pipeline_mode = #tpu.pipeline_mode<synchronous>, transform_indices = @transform_2, window_bounds = array<i64: 1, 128>}, {pipeline_mode = #tpu.pipeline_mode<synchronous>, transform_indices = @transform_3, window_bounds = array<i64: 128, 128>}, {pipeline_mode = #tpu.pipeline_mode<synchronous>, transform_indices = @transform_4, window_bounds = array<i64: 1, 128>}, {pipeline_mode = #tpu.pipeline_mode<synchronous>, transform_indices = @transform_5, window_bounds = array<i64: 128, 128>}, {pipeline_mode = #tpu.pipeline_mode<synchronous>, transform_indices = @transform_6, window_bounds = array<i64: 1, 128>}, {pipeline_mode = #tpu.pipeline_mode<synchronous>, transform_indices = @transform_7, window_bounds = array<i64: 128, 128>}, {pipeline_mode = #tpu.pipeline_mode<synchronous>, transform_indices = @transform_8, window_bounds = array<i64: 1, 128>}, {pipeline_mode = #tpu.pipeline_mode<synchronous>, transform_indices = @transform_9, window_bounds = array<i64: 128, 128>}, {pipeline_mode = #tpu.pipeline_mode<synchronous>, transform_indices = @transform_10, window_bounds = array<i64: 1, 128>}, {pipeline_mode = #tpu.pipeline_mode<synchronous>, transform_indices = @transform_11, window_bounds = array<i64: 128, 128>}, {pipeline_mode = #tpu.pipeline_mode<synchronous>, transform_indices = @transform_12, window_bounds = array<i64: 1, 128>}, {transform_indices = @transform_13, window_bounds = array<i64: 16, 128>}]} {
    %c0 = arith.constant 0 : index
    %c0_0 = arith.constant 0 : index
    %0 = vector.load %arg1[%c0, %c0_0] : memref<16x784xbf16, #tpu.memory_space<vmem>>, vector<16x784xbf16>
    %c0_1 = arith.constant 0 : index
    %c0_2 = arith.constant 0 : index
    %1 = vector.load %arg2[%c0_1, %c0_2] : memref<784x128xbf16, #tpu.memory_space<vmem>>, vector<784x128xbf16>
    %cst = arith.constant dense<0.000000e+00> : vector<16x128xf32>
    %2 = tpu.matmul %0, %1, %cst {dimension_numbers = #tpu.dot_dimension_numbers<[1], [0], [0], [1], [0, 0, 1, 1], [], []>} : vector<16x784xbf16>, vector<784x128xbf16>, vector<16x128xf32> -> vector<16x128xf32>
    %c0_3 = arith.constant 0 : index
    %c0_4 = arith.constant 0 : index
    %3 = vector.load %arg3[%c0_3, %c0_4] : memref<1x128xf32, #tpu.memory_space<vmem>>, vector<1x128xf32>
    %4 = vector.broadcast %3 : vector<1x128xf32> to vector<16x128xf32>
    %5 = arith.addf %2, %4 : vector<16x128xf32>
    %cst_5 = arith.constant 5.000000e-01 : f32
    %6 = vector.broadcast %cst_5 : f32 to vector<16x128xf32>
    %7 = arith.mulf %6, %5 : vector<16x128xf32>
    %8 = math.tanh %7 : vector<16x128xf32>
    %cst_6 = arith.constant 1.000000e+00 : f32
    %9 = vector.broadcast %cst_6 : f32 to vector<16x128xf32>
    %10 = arith.addf %8, %9 : vector<16x128xf32>
    %cst_7 = arith.constant 5.000000e-01 : f32
    %11 = vector.broadcast %cst_7 : f32 to vector<16x128xf32>
    %12 = arith.mulf %11, %10 : vector<16x128xf32>
    %13 = arith.truncf %12 : vector<16x128xf32> to vector<16x128xbf16>
    %c0_8 = arith.constant 0 : index
    %c0_9 = arith.constant 0 : index
    %14 = vector.load %arg4[%c0_8, %c0_9] : memref<128x128xbf16, #tpu.memory_space<vmem>>, vector<128x128xbf16>
    %cst_10 = arith.constant dense<0.000000e+00> : vector<16x128xf32>
    %15 = tpu.matmul %13, %14, %cst_10 {dimension_numbers = #tpu.dot_dimension_numbers<[1], [0], [0], [1], [0, 0, 1, 1], [], []>} : vector<16x128xbf16>, vector<128x128xbf16>, vector<16x128xf32> -> vector<16x128xf32>
    %c0_11 = arith.constant 0 : index
    %c0_12 = arith.constant 0 : index
    %16 = vector.load %arg5[%c0_11, %c0_12] : memref<1x128xf32, #tpu.memory_space<vmem>>, vector<1x128xf32>
    %17 = vector.broadcast %16 : vector<1x128xf32> to vector<16x128xf32>
    %18 = arith.addf %15, %17 : vector<16x128xf32>
    %cst_13 = arith.constant 5.000000e-01 : f32
    %19 = vector.broadcast %cst_13 : f32 to vector<16x128xf32>
    %20 = arith.mulf %19, %18 : vector<16x128xf32>
    %21 = math.tanh %20 : vector<16x128xf32>
    %cst_14 = arith.constant 1.000000e+00 : f32
    %22 = vector.broadcast %cst_14 : f32 to vector<16x128xf32>
    %23 = arith.addf %21, %22 : vector<16x128xf32>
    %cst_15 = arith.constant 5.000000e-01 : f32
    %24 = vector.broadcast %cst_15 : f32 to vector<16x128xf32>
    %25 = arith.mulf %24, %23 : vector<16x128xf32>
    %26 = arith.truncf %25 : vector<16x128xf32> to vector<16x128xbf16>
    %c0_16 = arith.constant 0 : index
    %c0_17 = arith.constant 0 : index
    %27 = vector.load %arg6[%c0_16, %c0_17] : memref<128x128xbf16, #tpu.memory_space<vmem>>, vector<128x128xbf16>
    %cst_18 = arith.constant dense<0.000000e+00> : vector<16x128xf32>
    %28 = tpu.matmul %26, %27, %cst_18 {dimension_numbers = #tpu.dot_dimension_numbers<[1], [0], [0], [1], [0, 0, 1, 1], [], []>} : vector<16x128xbf16>, vector<128x128xbf16>, vector<16x128xf32> -> vector<16x128xf32>
    %c0_19 = arith.constant 0 : index
    %c0_20 = arith.constant 0 : index
    %29 = vector.load %arg7[%c0_19, %c0_20] : memref<1x128xf32, #tpu.memory_space<vmem>>, vector<1x128xf32>
    %30 = vector.broadcast %29 : vector<1x128xf32> to vector<16x128xf32>
    %31 = arith.addf %28, %30 : vector<16x128xf32>
    %cst_21 = arith.constant 5.000000e-01 : f32
    %32 = vector.broadcast %cst_21 : f32 to vector<16x128xf32>
    %33 = arith.mulf %32, %31 : vector<16x128xf32>
    %34 = math.tanh %33 : vector<16x128xf32>
    %cst_22 = arith.constant 1.000000e+00 : f32
    %35 = vector.broadcast %cst_22 : f32 to vector<16x128xf32>
    %36 = arith.addf %34, %35 : vector<16x128xf32>
    %cst_23 = arith.constant 5.000000e-01 : f32
    %37 = vector.broadcast %cst_23 : f32 to vector<16x128xf32>
    %38 = arith.mulf %37, %36 : vector<16x128xf32>
    %39 = arith.truncf %38 : vector<16x128xf32> to vector<16x128xbf16>
    %c0_24 = arith.constant 0 : index
    %c0_25 = arith.constant 0 : index
    %40 = vector.load %arg8[%c0_24, %c0_25] : memref<128x128xbf16, #tpu.memory_space<vmem>>, vector<128x128xbf16>
    %cst_26 = arith.constant dense<0.000000e+00> : vector<16x128xf32>
    %41 = tpu.matmul %39, %40, %cst_26 {dimension_numbers = #tpu.dot_dimension_numbers<[1], [0], [0], [1], [0, 0, 1, 1], [], []>} : vector<16x128xbf16>, vector<128x128xbf16>, vector<16x128xf32> -> vector<16x128xf32>
    %c0_27 = arith.constant 0 : index
    %c0_28 = arith.constant 0 : index
    %42 = vector.load %arg9[%c0_27, %c0_28] : memref<1x128xf32, #tpu.memory_space<vmem>>, vector<1x128xf32>
    %43 = vector.broadcast %42 : vector<1x128xf32> to vector<16x128xf32>
    %44 = arith.addf %41, %43 : vector<16x128xf32>
    %cst_29 = arith.constant 5.000000e-01 : f32
    %45 = vector.broadcast %cst_29 : f32 to vector<16x128xf32>
    %46 = arith.mulf %45, %44 : vector<16x128xf32>
    %47 = math.tanh %46 : vector<16x128xf32>
    %cst_30 = arith.constant 1.000000e+00 : f32
    %48 = vector.broadcast %cst_30 : f32 to vector<16x128xf32>
    %49 = arith.addf %47, %48 : vector<16x128xf32>
    %cst_31 = arith.constant 5.000000e-01 : f32
    %50 = vector.broadcast %cst_31 : f32 to vector<16x128xf32>
    %51 = arith.mulf %50, %49 : vector<16x128xf32>
    %52 = arith.truncf %51 : vector<16x128xf32> to vector<16x128xbf16>
    %c0_32 = arith.constant 0 : index
    %c0_33 = arith.constant 0 : index
    %53 = vector.load %arg10[%c0_32, %c0_33] : memref<128x128xbf16, #tpu.memory_space<vmem>>, vector<128x128xbf16>
    %cst_34 = arith.constant dense<0.000000e+00> : vector<16x128xf32>
    %54 = tpu.matmul %52, %53, %cst_34 {dimension_numbers = #tpu.dot_dimension_numbers<[1], [0], [0], [1], [0, 0, 1, 1], [], []>} : vector<16x128xbf16>, vector<128x128xbf16>, vector<16x128xf32> -> vector<16x128xf32>
    %c0_35 = arith.constant 0 : index
    %c0_36 = arith.constant 0 : index
    %55 = vector.load %arg11[%c0_35, %c0_36] : memref<1x128xf32, #tpu.memory_space<vmem>>, vector<1x128xf32>
    %56 = vector.broadcast %55 : vector<1x128xf32> to vector<16x128xf32>
    %57 = arith.addf %54, %56 : vector<16x128xf32>
    %cst_37 = arith.constant 5.000000e-01 : f32
    %58 = vector.broadcast %cst_37 : f32 to vector<16x128xf32>
    %59 = arith.mulf %58, %57 : vector<16x128xf32>
    %60 = math.tanh %59 : vector<16x128xf32>
    %cst_38 = arith.constant 1.000000e+00 : f32
    %61 = vector.broadcast %cst_38 : f32 to vector<16x128xf32>
    %62 = arith.addf %60, %61 : vector<16x128xf32>
    %cst_39 = arith.constant 5.000000e-01 : f32
    %63 = vector.broadcast %cst_39 : f32 to vector<16x128xf32>
    %64 = arith.mulf %63, %62 : vector<16x128xf32>
    %65 = arith.truncf %64 : vector<16x128xf32> to vector<16x128xbf16>
    %c0_40 = arith.constant 0 : index
    %c0_41 = arith.constant 0 : index
    %66 = vector.load %arg12[%c0_40, %c0_41] : memref<128x128xbf16, #tpu.memory_space<vmem>>, vector<128x128xbf16>
    %cst_42 = arith.constant dense<0.000000e+00> : vector<16x128xf32>
    %67 = tpu.matmul %65, %66, %cst_42 {dimension_numbers = #tpu.dot_dimension_numbers<[1], [0], [0], [1], [0, 0, 1, 1], [], []>} : vector<16x128xbf16>, vector<128x128xbf16>, vector<16x128xf32> -> vector<16x128xf32>
    %c0_43 = arith.constant 0 : index
    %c0_44 = arith.constant 0 : index
    %68 = vector.load %arg13[%c0_43, %c0_44] : memref<1x128xf32, #tpu.memory_space<vmem>>, vector<1x128xf32>
    %69 = vector.broadcast %68 : vector<1x128xf32> to vector<16x128xf32>
    %70 = arith.addf %67, %69 : vector<16x128xf32>
    %cst_45 = arith.constant 5.000000e-01 : f32
    %71 = vector.broadcast %cst_45 : f32 to vector<16x128xf32>
    %72 = arith.mulf %71, %70 : vector<16x128xf32>
    %73 = math.tanh %72 : vector<16x128xf32>
    %cst_46 = arith.constant 1.000000e+00 : f32
    %74 = vector.broadcast %cst_46 : f32 to vector<16x128xf32>
    %75 = arith.addf %73, %74 : vector<16x128xf32>
    %cst_47 = arith.constant 5.000000e-01 : f32
    %76 = vector.broadcast %cst_47 : f32 to vector<16x128xf32>
    %77 = arith.mulf %76, %75 : vector<16x128xf32>
    %78 = tpu.iota {dimensions = array<i32: 1>} : vector<1x128xi32>
    %c10_i32 = arith.constant 10 : i32
    %79 = vector.broadcast %c10_i32 : i32 to vector<1x128xi32>
    %80 = arith.cmpi slt, %78, %79 : vector<1x128xi32>
    %cst_48 = arith.constant -1.000000e+30 : f32
    %81 = vector.shape_cast %80 : vector<1x128xi1> to vector<1x128xi1>
    %82 = vector.broadcast %81 : vector<1x128xi1> to vector<16x128xi1>
    %83 = vector.broadcast %cst_48 : f32 to vector<16x128xf32>
    %84 = arith.select %82, %77, %83 : vector<16x128xi1>, vector<16x128xf32>
    %cst_49 = arith.constant dense<0xFF800000> : vector<16xf32>
    %85 = vector.multi_reduction <maximumf>, %84, %cst_49 [1] : vector<16x128xf32> to vector<16xf32>
    %86 = vector.shape_cast %85 : vector<16xf32> to vector<16x1xf32>
    %87 = vector.broadcast %86 : vector<16x1xf32> to vector<16x128xf32>
    %88 = arith.subf %77, %87 : vector<16x128xf32>
    %89 = math.exp %88 : vector<16x128xf32>
    %cst_50 = arith.constant 0.000000e+00 : f32
    %90 = vector.shape_cast %80 : vector<1x128xi1> to vector<1x128xi1>
    %91 = vector.broadcast %90 : vector<1x128xi1> to vector<16x128xi1>
    %92 = vector.broadcast %cst_50 : f32 to vector<16x128xf32>
    %93 = arith.select %91, %89, %92 : vector<16x128xi1>, vector<16x128xf32>
    %cst_51 = arith.constant dense<0.000000e+00> : vector<16xf32>
    %94 = vector.multi_reduction <add>, %93, %cst_51 [1] : vector<16x128xf32> to vector<16xf32>
    %95 = vector.shape_cast %94 : vector<16xf32> to vector<16x1xf32>
    %96 = math.log %95 : vector<16x1xf32>
    %97 = vector.broadcast %96 : vector<16x1xf32> to vector<16x128xf32>
    %98 = arith.subf %88, %97 : vector<16x128xf32>
    %cst_52 = arith.constant 0.000000e+00 : f32
    %99 = vector.shape_cast %80 : vector<1x128xi1> to vector<1x128xi1>
    %100 = vector.broadcast %99 : vector<1x128xi1> to vector<16x128xi1>
    %101 = vector.broadcast %cst_52 : f32 to vector<16x128xf32>
    %102 = arith.select %100, %98, %101 : vector<16x128xi1>, vector<16x128xf32>
    %103 = arith.truncf %102 : vector<16x128xf32> to vector<16x128xbf16>
    %c0_53 = arith.constant 0 : index
    %c0_54 = arith.constant 0 : index
    %104 = vector.load %arg14[%c0_53, %c0_54] : memref<16x128xbf16, #tpu.memory_space<vmem>>, vector<16x128xbf16>
    tpu.vector_store %arg14[%c0_53, %c0_54], %103 {strides = array<i32>} : memref<16x128xbf16, #tpu.memory_space<vmem>>, vector<16x128xbf16>,
    return
  }
  func.func @transform_0(%arg0: i32) -> (i32, i32) {
    %c0_i32 = arith.constant 0 : i32
    %c0_i32_0 = arith.constant 0 : i32
    return %arg0, %c0_i32 : i32, i32
  }
  func.func @transform_1(%arg0: i32) -> (i32, i32) {
    %c0_i32 = arith.constant 0 : i32
    %c0_i32_0 = arith.constant 0 : i32
    %c0_i32_1 = arith.constant 0 : i32
    return %c0_i32, %c0_i32_0 : i32, i32
  }
  func.func @transform_2(%arg0: i32) -> (i32, i32) {
    %c0_i32 = arith.constant 0 : i32
    %c0_i32_0 = arith.constant 0 : i32
    %c0_i32_1 = arith.constant 0 : i32
    return %c0_i32, %c0_i32_0 : i32, i32
  }
  func.func @transform_3(%arg0: i32) -> (i32, i32) {
    %c0_i32 = arith.constant 0 : i32
    %c0_i32_0 = arith.constant 0 : i32
    %c0_i32_1 = arith.constant 0 : i32
    return %c0_i32, %c0_i32_0 : i32, i32
  }
  func.func @transform_4(%arg0: i32) -> (i32, i32) {
    %c0_i32 = arith.constant 0 : i32
    %c0_i32_0 = arith.constant 0 : i32
    %c0_i32_1 = arith.constant 0 : i32
    return %c0_i32, %c0_i32_0 : i32, i32
  }
  func.func @transform_5(%arg0: i32) -> (i32, i32) {
    %c0_i32 = arith.constant 0 : i32
    %c0_i32_0 = arith.constant 0 : i32
    %c0_i32_1 = arith.constant 0 : i32
    return %c0_i32, %c0_i32_0 : i32, i32
  }
  func.func @transform_6(%arg0: i32) -> (i32, i32) {
    %c0_i32 = arith.constant 0 : i32
    %c0_i32_0 = arith.constant 0 : i32
    %c0_i32_1 = arith.constant 0 : i32
    return %c0_i32, %c0_i32_0 : i32, i32
  }
  func.func @transform_7(%arg0: i32) -> (i32, i32) {
    %c0_i32 = arith.constant 0 : i32
    %c0_i32_0 = arith.constant 0 : i32
    %c0_i32_1 = arith.constant 0 : i32
    return %c0_i32, %c0_i32_0 : i32, i32
  }
  func.func @transform_8(%arg0: i32) -> (i32, i32) {
    %c0_i32 = arith.constant 0 : i32
    %c0_i32_0 = arith.constant 0 : i32
    %c0_i32_1 = arith.constant 0 : i32
    return %c0_i32, %c0_i32_0 : i32, i32
  }
  func.func @transform_9(%arg0: i32) -> (i32, i32) {
    %c0_i32 = arith.constant 0 : i32
    %c0_i32_0 = arith.constant 0 : i32
    %c0_i32_1 = arith.constant 0 : i32
    return %c0_i32, %c0_i32_0 : i32, i32
  }
  func.func @transform_10(%arg0: i32) -> (i32, i32) {
    %c0_i32 = arith.constant 0 : i32
    %c0_i32_0 = arith.constant 0 : i32
    %c0_i32_1 = arith.constant 0 : i32
    return %c0_i32, %c0_i32_0 : i32, i32
  }
  func.func @transform_11(%arg0: i32) -> (i32, i32) {
    %c0_i32 = arith.constant 0 : i32
    %c0_i32_0 = arith.constant 0 : i32
    %c0_i32_1 = arith.constant 0 : i32
    return %c0_i32, %c0_i32_0 : i32, i32
  }
  func.func @transform_12(%arg0: i32) -> (i32, i32) {
    %c0_i32 = arith.constant 0 : i32
    %c0_i32_0 = arith.constant 0 : i32
    %c0_i32_1 = arith.constant 0 : i32
    return %c0_i32, %c0_i32_0 : i32, i32
  }
  func.func @transform_13(%arg0: i32) -> (i32, i32) {
    %c0_i32 = arith.constant 0 : i32
    %c0_i32_0 = arith.constant 0 : i32
    return %arg0, %c0_i32 : i32, i32
  }
}

</mosaic_0001>

<bundles_post_ra>
// kernel: neural_net_f_forward.1
= control target key start
LH: loop header
LB: loop body
LE: loop exit
PB: predicated region body
PF: predicated region fallthrough
CT: control target
= control target key end

     0   :  { %v1777_v38 = vmov 0.0   ;;  %vm1778_vm0 = vmmov 0   ;;  %vm487_vm1 = vcmask 130048   ;;  %s2217_s1 = inlined_call_operand.vmem [shape: bf16[784,128], index: 1, kind: input, shape index: {}]   ;;  %s2218_s0 = inlined_call_operand.vmem [shape: bf16[16,784], index: 0, kind: input, shape index: {}]   ;;  %s2219_s3 = inlined_call_operand.vmem [shape: bf16[128,128], index: 3, kind: input, shape index: {}]   ;;  %s2220_s5 = inlined_call_operand.vmem [shape: bf16[128,128], index: 5, kind: input, shape index: {}]   ;;  %s2221_s2 = inlined_call_operand.vmem [shape: f32[1,128], index: 2, kind: input, shape index: {}]   ;;  %s2222_s7 = inlined_call_operand.vmem [shape: bf16[128,128], index: 7, kind: input, shape index: {}]   ;;  %s2223_s4 = inlined_call_operand.vmem [shape: f32[1,128], index: 4, kind: input, shape index: {}]   ;;  %s2224_s9 = inlined_call_operand.vmem [shape: bf16[128,128], index: 9, kind: input, shape index: {}]   ;;  %s2225_s6 = inlined_call_operand.vmem [shape: f32[1,128], index: 6, kind: input, shape index: {}]   ;;  %s2226_s11 = inlined_call_operand.vmem [shape: bf16[128,128], index: 11, kind: input, shape index: {}]   ;;  %s2227_s8 = inlined_call_operand.vmem [shape: f32[1,128], index: 8, kind: input, shape index: {}]   ;;  %s2228_s10 = inlined_call_operand.vmem [shape: f32[1,128], index: 10, kind: input, shape index: {}]   ;;  %s2229_s12 = inlined_call_operand.vmem [shape: f32[1,128], index: 12, kind: input, shape index: {}]   ;;  %s2230_s13 = inlined_call_operand.vmem [shape: bf16[16,128], index: 13, kind: output, shape index: {}]  }
   0x1   :  { %v1646_v0 = vld [vmem:[%s2217_s1 + $0x78] sm:$0xff]   ;;  %v1650_v4 = vld [vmem:[%s2217_s1 + $0x70] sm:$0xff]   ;;  %v1654_v8 = vld [vmem:[%s2217_s1 + $0x68] sm:$0xff]  }
   0x2   :  { %v1647_v1 = vld [vmem:[%s2217_s1 + $0x38] sm:$0xff]   ;;  %1425 = vmatprep.subr.bf16.mxu0 %v1646_v0  ;;  %v1651_v5 = vld [vmem:[%s2217_s1 + $0x30] sm:$0xff]   ;;  %v1655_v9 = vld [vmem:[%s2217_s1 + $0x28] sm:$0xff]  }
   0x3   :  { %v1648_v2 = vld [vmem:[%s2217_s1 + $0xf8] sm:$0xff]   ;;  %1426 = vmatpush3.bf16.msra.mxu0 %v1647_v1  ;;  %v1652_v6 = vld [vmem:[%s2217_s1 + $0xf0] sm:$0xff]   ;;  %v1656_v10 = vld [vmem:[%s2217_s1 + $0xe8] sm:$0xff]  }
   0x4   :  { %v1649_v3 = vld [vmem:[%s2217_s1 + $0xb8] sm:$0xff]   ;;  %1447 = vmatprep.subr.bf16.mxu1 %v1648_v2  ;;  %1427 = vmatprep.subr.bf16.mxu0 %v1650_v4  ;;  %v1653_v7 = vld [vmem:[%s2217_s1 + $0xb0] sm:$0xff]   ;;  %v1657_v11 = vld [vmem:[%s2217_s1 + $0xa8] sm:$0xff]  }
   0x5   :  { %1448 = vmatpush3.bf16.msra.mxu1 %v1649_v3  ;;  %v1658_v12 = vld [vmem:[%s2217_s1 + $0x60] sm:$0xff]   ;;  %v1662_v16 = vld [vmem:[%s2217_s1 + $0x58] sm:$0xff]   ;;  %v1666_v20 = vld [vmem:[%s2217_s1 + $0x50] sm:$0xff]  }
   0x6   :  { %1449 = vmatprep.subr.bf16.mxu1 %v1652_v6  ;;  %v1659_v13 = vld [vmem:[%s2217_s1 + $0x20] sm:$0xff]   ;;  %v1663_v17 = vld [vmem:[%s2217_s1 + $0x18] sm:$0xff]   ;;  %v1667_v21 = vld [vmem:[%s2217_s1 + $0x10] sm:$0xff]  }
   0x7   :  { %1428 = vmatpush3.bf16.msra.mxu0 %v1651_v5  ;;  %v1660_v14 = vld [vmem:[%s2217_s1 + $0xe0] sm:$0xff]   ;;  %v1664_v18 = vld [vmem:[%s2217_s1 + $0xd8] sm:$0xff]   ;;  %v1668_v22 = vld [vmem:[%s2217_s1 + $0xd0] sm:$0xff]  }
   0x8   :  { %1429 = vmatprep.subr.bf16.mxu0 %v1654_v8  ;;  %v1661_v15 = vld [vmem:[%s2217_s1 + $0xa0] sm:$0xff]   ;;  %v1665_v19 = vld [vmem:[%s2217_s1 + $0x98] sm:$0xff]   ;;  %v1669_v23 = vld [vmem:[%s2217_s1 + $0x90] sm:$0xff]  }
   0x9   :  { %1450 = vmatpush3.bf16.msra.mxu1 %v1653_v7  ;;  %v1670_v24 = vld [vmem:[%s2217_s1 + $0x48] sm:$0xff]   ;;  %v1674_v28 = vld [vmem:[%s2217_s1 + $0x40] sm:$0xff]   ;;  %v1681_v34 = vld [vmem:[%s2217_s1 + $0x178] sm:$0xff]  }
   0xa   :  { %1451 = vmatprep.subr.bf16.mxu1 %v1656_v10  ;;  %v1671_v25 = vld [vmem:[%s2217_s1 + $0x8] sm:$0xff]   ;;  %v1675_v29 = vld [vmem:[%s2217_s1] sm:$0xff]   ;;  %v1685_v37 = vld [vmem:[%s2217_s1 + $0x138] sm:$0xff]  }
   0xb   :  { %1430 = vmatpush3.bf16.msra.mxu0 %v1655_v9  ;;  %v1672_v26 = vld [vmem:[%s2217_s1 + $0xc8] sm:$0xff]   ;;  %v1676_v30 = vld [vmem:[%s2217_s1 + $0xc0] sm:$0xff]   ;;  %v1686_v39 = vld [vmem:[%s2217_s1 + $0x170] sm:$0xff]  }
   0xc   :  { %1431 = vmatprep.subr.bf16.mxu0 %v1658_v12  ;;  %v1673_v27 = vld [vmem:[%s2217_s1 + $0x88] sm:$0xff]   ;;  %v1677_v31 = vld [vmem:[%s2218_s0] ss:$28 sps:$4 sm:$0xff]   ;;  %v1687_v40 = vld [vmem:[%s2217_s1 + $0x130] sm:$0xff]  }
   0xd   :  { %1452 = vmatpush3.bf16.msra.mxu1 %v1657_v11  ;;  %v1679_v32 = vld [vmem:[%s2218_s0 + $0x4] ss:$28 sps:$4 sm:$0xff]   ;;  %v1684_v36 = vld [vmem:[%s2218_s0 + $0xc] ss:$28 sps:$4 sm:$0xff]   ;;  %v1692_v45 = vld [vmem:[%s2217_s1 + $0x158] sm:$0xff]  }
   0xe   :  { %1453 = vmatprep.subr.bf16.mxu1 %v1660_v14  ;;  %v1680_v33 = vld [vmem:[%s2217_s1 + $0x80] sm:$0xff]   ;;  %523 = vmatprep.mubr.bf16.mxu0 %v1679_v32  ;;  %v1688_v41 = vld [vmem:[%s2217_s1 + $0x168] sm:$0xff]   ;;  %v1693_v46 = vld [vmem:[%s2217_s1 + $0x118] sm:$0xff]  }
   0xf   :  { %1432 = vmatpush3.bf16.msra.mxu0 %v1659_v13  ;;  %v1682_v35 = vld [vmem:[%s2218_s0 + $0x8] ss:$28 sps:$4 sm:$0xff]   ;;  %564 = vmatprep.mubr.bf16.mxu1 %v1684_v36  ;;  %v1694_v47 = vld [vmem:[%s2217_s1 + $0x150] sm:$0xff]   ;;  %v1705_v57 = vld [vmem:[%s2219_s3 + $0x38] sm:$0xff]  }
  0x10   :  { %1433 = vmatprep.subr.bf16.mxu0 %v1662_v16  ;;  %v1689_v42 = vld [vmem:[%s2217_s1 + $0x128] sm:$0xff]   ;;  %v1690_v43 = vld [vmem:[%s2217_s1 + $0x160] sm:$0xff]   ;;  %v1703_v49 = vld [vmem:[%s2218_s0 + $0x14] ss:$28 sps:$4 sm:$0xff]  }
  0x11   :  { %1454 = vmatpush3.bf16.msra.mxu1 %v1661_v15  ;;  %v1691_v44 = vld [vmem:[%s2217_s1 + $0x120] sm:$0xff]   ;;  %v1704_v50 = vld [vmem:[%s2218_s0 + $0x18] ss:$28 sps:$4 sm:$0xff]   ;;  %v1696_v52 = vld [vmem:[%s2217_s1 + $0x148] sm:$0xff]  }
  0x12   :  { %1455 = vmatprep.subr.bf16.mxu1 %v1664_v18  ;;  %v1700_v48 = vld [vmem:[%s2217_s1 + $0x180] sm:$0xff]   ;;  %v1695_v51 = vld [vmem:[%s2217_s1 + $0x110] sm:$0xff]   ;;  %v1697_v53 = vld [vmem:[%s2217_s1 + $0x108] sm:$0xff]  }
  0x13   :  { %1434 = vmatpush3.bf16.msra.mxu0 %v1663_v17  ;;  %v1698_v54 = vld [vmem:[%s2217_s1 + $0x140] sm:$0xff]   ;;  %v1701_v56 = vld [vmem:[%s2218_s0 + $0x10] ss:$28 sps:$4 sm:$0xff]   ;;  %v1709_v61 = vld [vmem:[%s2219_s3 + $0x18] sm:$0xff]  }
  0x14   :  { %1435 = vmatprep.subr.bf16.mxu0 %v1666_v20  ;;  %v1699_v55 = vld [vmem:[%s2217_s1 + $0x100] sm:$0xff]   ;;  %v1706_v58 = vld [vmem:[%s2219_s3 + $0x30] sm:$0xff]   ;;  %v1707_v59 = vld [vmem:[%s2219_s3 + $0x28] sm:$0xff]  }
  0x15   :  { %1456 = vmatpush3.bf16.msra.mxu1 %v1665_v19  ;;  %v1708_v60 = vld [vmem:[%s2219_s3 + $0x20] sm:$0xff]   ;;  %v1710_v62 = vld [vmem:[%s2219_s3 + $0x10] sm:$0xff]   ;;  %v1711_v63 = vld [vmem:[%s2219_s3 + $0x8] sm:$0xff]  }
  0x16   :  { %1457 = vmatprep.subr.bf16.mxu1 %v1668_v22  ;;  %v1712_v0 = vld [vmem:[%s2219_s3] sm:$0xff]   ;;  %v1713_v1 = vld [vmem:[%s2220_s5 + $0x38] sm:$0xff]  }
  0x17   :  { %1436 = vmatpush3.bf16.msra.mxu0 %v1667_v21  ;;  %v1313_v14 = vld [vmem:[%s2221_s2] ss:$0 sm:$0xff] }
  0x18   :  { %1437 = vmatprep.subr.bf16.mxu0 %v1670_v24 }
  0x19   :  { %1458 = vmatpush3.bf16.msra.mxu1 %v1669_v23 }
  0x1a   :  { %1459 = vmatprep.subr.bf16.mxu1 %v1672_v26 }
  0x1b   :  { %1438 = vmatpush3.bf16.msra.mxu0 %v1671_v25 }
  0x1c   :  { %1439 = vmatprep.subr.bf16.mxu0 %v1674_v28 }
  0x1d   :  { %1460 = vmatpush3.bf16.msra.mxu1 %v1673_v27 }
  0x1e   :  { %1461 = vmatprep.subr.bf16.mxu1 %v1676_v30 }
  0x1f   :  { %1440 = vmatpush3.bf16.msra.mxu0 %v1675_v29 }
  0x20   :  { %1469 = vmatprep.subr.bf16.mxu0 %v1681_v34 }
  0x21   :  { %1462 = vmatpush3.bf16.msra.mxu1 %v1680_v33 }
  0x22   :  { %524 = vmatmul.mubr.bf16.vlgmr.msra.gmra.mxu0 %v1677_v31  ;;  %1538 = vmatprep.subr.bf16.mxu1 %v1777_v38 }
  0x23   :  { %1470 = vmatpush3.bf16.msra.mxu0 %v1685_v37  ;;  %605 = vmatprep.mubr.bf16.mxu0 %v1703_v49  ;;  %v1720_v49 = vld [vmem:[%s2220_s5] sm:$0xff]  }
  0x24   :  { %565 = vmatmul.mubr.bf16.vlgmr.msra.gmra.mxu1 %v1682_v35  ;;  %1471 = vmatprep.subr.bf16.mxu0 %v1686_v39 }
  0x25   :  { %1540 = vmatprep.mubr.msk.bf16.mxu1 %vm1778_vm0, %v1777_v38  ;;  %1539 = vmatpush3.bf16.msra.mxu1 %v1700_v48  ;;  %v1719_v48 = vld [vmem:[%s2220_s5 + $0x8] sm:$0xff]  }
  0x26   :  { %1544 = vmatprep.subr.bf16.mxu1 %v1777_v38 }
  0x27   :  { %1472 = vmatpush3.bf16.msra.mxu0 %v1687_v40 }
  0x28   :  { %1473 = vmatprep.subr.bf16.mxu0 %v1688_v41 }
  0x2b   :  { %1474 = vmatpush3.bf16.msra.mxu0 %v1689_v42 }
  0x2c   :  { %1475 = vmatprep.subr.bf16.mxu0 %v1690_v43  ;;  %1541 = vmatmul.mubr.msk.bf16.vlgmr.msra.gmra.mxu1 %vm487_vm1, %v1704_v50  ;;  %v1714_v43 = vld [vmem:[%s2220_s5 + $0x30] sm:$0xff]   ;;  %v1721_v50 = vld [vmem:[%s2222_s7 + $0x38] sm:$0xff]  }
  0x2d   :  { %1560 = vmatprep.mubr.msk.bf16.mxu1 %vm1778_vm0, %v1777_v38  ;;  %1545 = vmatpush3.bf16.msra.mxu1 %v1705_v57 }
  0x2e   :  { %1546 = vmatprep.subr.bf16.mxu1 %v1777_v38 }
  0x2f   :  { %1476 = vmatpush3.bf16.msra.mxu0 %v1691_v44  ;;  %v1715_v44 = vld [vmem:[%s2220_s5 + $0x28] sm:$0xff]  }
  0x30   :  { %1477 = vmatprep.subr.bf16.mxu0 %v1692_v45  ;;  %v1716_v45 = vld [vmem:[%s2220_s5 + $0x20] sm:$0xff]  }
  0x31   :  { %1547 = vmatpush3.bf16.msra.mxu1 %v1706_v58 }
  0x32   :  { %1548 = vmatprep.subr.bf16.mxu1 %v1777_v38 }
  0x33   :  { %1478 = vmatpush3.bf16.msra.mxu0 %v1693_v46  ;;  %v1717_v46 = vld [vmem:[%s2220_s5 + $0x18] sm:$0xff]  }
  0x34   :  { %1479 = vmatprep.subr.bf16.mxu0 %v1694_v47  ;;  %v1718_v47 = vld [vmem:[%s2220_s5 + $0x10] sm:$0xff]  }
  0x35   :  { %1549 = vmatpush3.bf16.msra.mxu1 %v1707_v59 }
  0x36   :  { %1550 = vmatprep.subr.bf16.mxu1 %v1777_v38 }
  0x37   :  { %1480 = vmatpush3.bf16.msra.mxu0 %v1695_v51  ;;  %v1371_v51 = vld [vmem:[%s2223_s4] ss:$0 sm:$0xff] }
  0x38   :  { %1481 = vmatprep.subr.bf16.mxu0 %v1696_v52 }
  0x39   :  { %1551 = vmatpush3.bf16.msra.mxu1 %v1708_v60 }
  0x3a   :  { %1552 = vmatprep.subr.bf16.mxu1 %v1777_v38 }
  0x3b   :  { %1482 = vmatpush3.bf16.msra.mxu0 %v1697_v53 }
  0x3c   :  { %1483 = vmatprep.subr.bf16.mxu0 %v1698_v54 }
  0x3d   :  { %1553 = vmatpush3.bf16.msra.mxu1 %v1709_v61 }
  0x3e   :  { %1554 = vmatprep.subr.bf16.mxu1 %v1777_v38 }
  0x3f   :  { %1484 = vmatpush3.bf16.msra.mxu0 %v1699_v55 }
  0x40   :  { %1564 = vmatprep.subr.bf16.mxu0 %v1777_v38 }
  0x41   :  { %1555 = vmatpush3.bf16.msra.mxu1 %v1710_v62 }
  0x42   :  { %606 = vmatmul.mubr.bf16.vlgmr.msra.gmra.mxu0 %v1701_v56  ;;  %1556 = vmatprep.subr.bf16.mxu1 %v1777_v38 }
  0x43   :  { %1580 = vmatprep.mubr.msk.bf16.mxu0 %vm1778_vm0, %v1777_v38  ;;  %1565 = vmatpush3.bf16.msra.mxu0 %v1713_v1 }
  0x44   :  { %1566 = vmatprep.subr.bf16.mxu0 %v1777_v38 }
  0x45   :  { %1557 = vmatpush3.bf16.msra.mxu1 %v1711_v63 }
  0x46   :  { %1558 = vmatprep.subr.bf16.mxu1 %v1777_v38 }
  0x47   :  { %1567 = vmatpush3.bf16.msra.mxu0 %v1714_v43 }
  0x48   :  { %1568 = vmatprep.subr.bf16.mxu0 %v1777_v38 }
  0x49   :  { %1559 = vmatpush3.bf16.msra.mxu1 %v1712_v0 }
  0x4a   :  { %1584 = vmatprep.subr.bf16.mxu1 %v1777_v38 }
  0x4b   :  { %1569 = vmatpush3.bf16.msra.mxu0 %v1715_v44 }
  0x4c   :  { %1570 = vmatprep.subr.bf16.mxu0 %v1777_v38 }
  0x4f   :  { %1571 = vmatpush3.bf16.msra.mxu0 %v1716_v45 }
  0x50   :  { %1572 = vmatprep.subr.bf16.mxu0 %v1777_v38 }
  0x53   :  { %1573 = vmatpush3.bf16.msra.mxu0 %v1717_v46 }
  0x54   :  { %1574 = vmatprep.subr.bf16.mxu0 %v1777_v38 }
  0x57   :  { %1575 = vmatpush3.bf16.msra.mxu0 %v1718_v47 }
  0x58   :  { %1576 = vmatprep.subr.bf16.mxu0 %v1777_v38 }
  0x5b   :  { %1577 = vmatpush3.bf16.msra.mxu0 %v1719_v48 }
  0x5c   :  { %1578 = vmatprep.subr.bf16.mxu0 %v1777_v38 }
  0x5f   :  { %1579 = vmatpush3.bf16.msra.mxu0 %v1720_v49 }
  0x60   :  { %1604 = vmatprep.subr.bf16.mxu0 %v1777_v38 }
  0xe2   :  { %v1441_v5 = vpop.f32.mrf.mxu0 }
  0xe4   :  { %v1463_v2 = vpop.f32.mrf.mxu1  ;;  %v1442_v8 = vpop.f32.mrf.mxu0 }
  0xe5   :  { %v1443_v13 = vadd.f32 %v1442_v8, %v1441_v5  ;;  %v1724_v5 = vld [vmem:[%s2222_s7 + $0x20] sm:$0xff]   ;;  %v1727_v8 = vld [vmem:[%s2222_s7 + $0x8] sm:$0xff]  }
  0xe6   :  { %v1464_v3 = vpop.f32.mrf.mxu1  ;;  %v1444_v11 = vpop.f32.mrf.mxu0 }
  0xe7   :  { %v526_v16 = vadd.f32 %v1443_v13, %v1313_v14  ;;  %v1465_v17 = vadd.f32 %v1464_v3, %v1463_v2  ;;  %v1722_v3 = vld [vmem:[%s2222_s7 + $0x30] sm:$0xff]  }
  0xe8   :  { %v1466_v4 = vpop.f32.mrf.mxu1  ;;  %v1445_v15 = vpop.f32.mrf.mxu0 }
  0xe9   :  { %v1446_v18 = vadd.f32 %v1445_v15, %v1444_v11  ;;  %v567_v21 = vadd.f32 %v1465_v17, %v526_v16  ;;  %v1380_v11 = vld [vmem:[%s2225_s6] ss:$0 sm:$0xff] }
  0xea   :  { %v1467_v6 = vpop.f32.mrf.mxu1 }
  0xeb   :  { %v529_v22 = vadd.f32 %v1446_v18, %v1313_v14  ;;  %v1468_v23 = vadd.f32 %v1467_v6, %v1466_v4  ;;  %v1723_v4 = vld [vmem:[%s2222_s7 + $0x28] sm:$0xff]   ;;  %v1725_v6 = vld [vmem:[%s2222_s7 + $0x18] sm:$0xff]  }
  0xec   :  { %v648_v7 = vpop.f32.mrf.mxu1 }
  0xed   :  { %v570_v28 = vadd.f32 %v1468_v23, %v529_v22 }
  0xee   :  { %v1542_v9 = vpop.f32.mrf.mxu1 }
  0xef   :  { %v1728_v9 = vld [vmem:[%s2222_s7] sm:$0xff]  }
  0xf0   :  { %v651_v10 = vpop.f32.mrf.mxu1 }
  0xf2   :  { %v1543_v12 = vpop.f32.mrf.mxu1 }
 0x102   :  { %v1485_v19 = vpop.f32.mrf.mxu0 }
 0x104   :  { %v1486_v20 = vpop.f32.mrf.mxu0 }
 0x105   :  { %v1487_v24 = vadd.f32 %v1486_v20, %v1485_v19 }
 0x106   :  { %v1488_v25 = vpop.f32.mrf.mxu0 }
 0x107   :  { %v608_v26 = vadd.f32 %v1487_v24, %v567_v21 }
 0x108   :  { %v1489_v27 = vpop.f32.mrf.mxu0 }
 0x109   :  { %v649_v29 = vadd.f32 %v648_v7, %v608_v26  ;;  %v1490_v30 = vadd.f32 %v1489_v27, %v1488_v25  ;;  %v1726_v7 = vld [vmem:[%s2222_s7 + $0x10] sm:$0xff]  }
 0x10a   :  { %v1730_v27 = vld [vmem:[%s2224_s9 + $0x30] sm:$0xff]  }
 0x10b   :  { %v655_v31 = vmul.f32 0.5, %v649_v29  ;;  %v611_v32 = vadd.f32 %v1490_v30, %v570_v28  ;;  %v1731_v28 = vld [vmem:[%s2224_s9 + $0x28] sm:$0xff]   ;;  %v1732_v29 = vld [vmem:[%s2224_s9 + $0x20] sm:$0xff]   ;;  %v1733_v30 = vld [vmem:[%s2224_s9 + $0x18] sm:$0xff]  }
 0x10d   :  { %1745 = vtanh.f32 %v655_v31  ;;  %v652_v33 = vadd.f32 %v651_v10, %v611_v32  ;;  %v1729_v10 = vld [vmem:[%s2224_s9 + $0x38] sm:$0xff]   ;;  %v1734_v31 = vld [vmem:[%s2224_s9 + $0x10] sm:$0xff]   ;;  %v1735_v32 = vld [vmem:[%s2224_s9 + $0x8] sm:$0xff]  }
 0x10f   :  { %v656_v34 = vmul.f32 0.5, %v652_v33  ;;  %v1736_v33 = vld [vmem:[%s2224_s9] sm:$0xff]  }
 0x111   :  { %1747 = vtanh.f32 %v656_v34  ;;  %v1737_v34 = vld [vmem:[%s2226_s11 + $0x38] sm:$0xff]  }
 0x11a   :  { %v1746_v35 = vpop.eup %1745 }
 0x11b   :  { %v659_v36 = vadd.f32 1.0, %v1746_v35  ;;  %v1389_v35 = vld [vmem:[%s2227_s8] ss:$0 sm:$0xff] }
 0x11d   :  { %v661_v40 = vmul.f32 0.5, %v659_v36 }
 0x11e   :  { %v1748_v37 = vpop.eup %1747 }
 0x11f   :  { %v660_v39 = vadd.f32 1.0, %v1748_v37 }
 0x121   :  { %v662_v41 = vmul.f32 0.5, %v660_v39 }
 0x123   :  { %v663_v42 = vpack.c.bf16 %v662_v41, %v661_v40 }
 0x125   :  { %1561 = vmatmul.mubr.bf16.vlgmr.msra.gmra.mxu1 %v663_v42 }
 0x126   :  { %1600 = vmatprep.mubr.msk.bf16.mxu1 %vm1778_vm0, %v1777_v38  ;;  %1585 = vmatpush3.bf16.msra.mxu1 %v1721_v50 }
 0x127   :  { %1586 = vmatprep.subr.bf16.mxu1 %v1777_v38 }
 0x12a   :  { %1587 = vmatpush3.bf16.msra.mxu1 %v1722_v3 }
 0x12b   :  { %1588 = vmatprep.subr.bf16.mxu1 %v1777_v38 }
 0x12e   :  { %1589 = vmatpush3.bf16.msra.mxu1 %v1723_v4 }
 0x12f   :  { %1590 = vmatprep.subr.bf16.mxu1 %v1777_v38 }
 0x132   :  { %1591 = vmatpush3.bf16.msra.mxu1 %v1724_v5 }
 0x133   :  { %1592 = vmatprep.subr.bf16.mxu1 %v1777_v38 }
 0x136   :  { %1593 = vmatpush3.bf16.msra.mxu1 %v1725_v6 }
 0x137   :  { %1594 = vmatprep.subr.bf16.mxu1 %v1777_v38 }
 0x13a   :  { %1595 = vmatpush3.bf16.msra.mxu1 %v1726_v7 }
 0x13b   :  { %1596 = vmatprep.subr.bf16.mxu1 %v1777_v38 }
 0x13e   :  { %1597 = vmatpush3.bf16.msra.mxu1 %v1727_v8 }
 0x13f   :  { %1598 = vmatprep.subr.bf16.mxu1 %v1777_v38 }
 0x142   :  { %1599 = vmatpush3.bf16.msra.mxu1 %v1728_v9 }
 0x143   :  { %1624 = vmatprep.subr.bf16.mxu1 %v1777_v38 }
 0x1e5   :  { %v769_v52 = vpop.f32.mrf.mxu1 }
 0x1e6   :  { %v770_v53 = vadd.f32 %v1371_v51, %v769_v52  ;;  %v1738_v52 = vld [vmem:[%s2226_s11 + $0x30] sm:$0xff]  }
 0x1e7   :  { %v1562_v54 = vpop.f32.mrf.mxu1 }
 0x1e8   :  { %v776_v55 = vmul.f32 0.5, %v770_v53  ;;  %v1739_v53 = vld [vmem:[%s2226_s11 + $0x28] sm:$0xff]   ;;  %v1740_v54 = vld [vmem:[%s2226_s11 + $0x20] sm:$0xff]  }
 0x1e9   :  { %v772_v56 = vpop.f32.mrf.mxu1 }
 0x1ea   :  { %1749 = vtanh.f32 %v776_v55  ;;  %v773_v57 = vadd.f32 %v1371_v51, %v772_v56  ;;  %v1741_v55 = vld [vmem:[%s2226_s11 + $0x18] sm:$0xff]   ;;  %v1742_v56 = vld [vmem:[%s2226_s11 + $0x10] sm:$0xff]  }
 0x1eb   :  { %v1563_v58 = vpop.f32.mrf.mxu1 }
 0x1ec   :  { %v777_v59 = vmul.f32 0.5, %v773_v57  ;;  %v1743_v57 = vld [vmem:[%s2226_s11 + $0x8] sm:$0xff]   ;;  %v1744_v58 = vld [vmem:[%s2226_s11] sm:$0xff]  }
 0x1ee   :  { %1751 = vtanh.f32 %v777_v59  ;;  %v1398_v59 = vld [vmem:[%s2228_s10] ss:$0 sm:$0xff] }
 0x1f7   :  { %v1750_v60 = vpop.eup %1749 }
 0x1f8   :  { %v780_v61 = vadd.f32 1.0, %v1750_v60 }
 0x1fa   :  { %v782_v0 = vmul.f32 0.5, %v780_v61 }
 0x1fb   :  { %v1752_v62 = vpop.eup %1751 }
 0x1fc   :  { %v781_v63 = vadd.f32 1.0, %v1752_v62 }
 0x1fe   :  { %v783_v1 = vmul.f32 0.5, %v781_v63 }
 0x200   :  { %v784_v2 = vpack.c.bf16 %v783_v1, %v782_v0 }
 0x202   :  { %1581 = vmatmul.mubr.bf16.vlgmr.msra.gmra.mxu0 %v784_v2 }
 0x203   :  { %1620 = vmatprep.mubr.msk.bf16.mxu0 %vm1778_vm0, %v1777_v38  ;;  %1605 = vmatpush3.bf16.msra.mxu0 %v1729_v10  ;;  %v1407_v10 = vld [vmem:[%s2229_s12] ss:$0 sm:$0xff] }
 0x204   :  { %1606 = vmatprep.subr.bf16.mxu0 %v1777_v38 }
 0x207   :  { %1607 = vmatpush3.bf16.msra.mxu0 %v1730_v27 }
 0x208   :  { %1608 = vmatprep.subr.bf16.mxu0 %v1777_v38 }
 0x20b   :  { %1609 = vmatpush3.bf16.msra.mxu0 %v1731_v28 }
 0x20c   :  { %1610 = vmatprep.subr.bf16.mxu0 %v1777_v38 }
 0x20f   :  { %1611 = vmatpush3.bf16.msra.mxu0 %v1732_v29 }
 0x210   :  { %1612 = vmatprep.subr.bf16.mxu0 %v1777_v38 }
 0x213   :  { %1613 = vmatpush3.bf16.msra.mxu0 %v1733_v30 }
 0x214   :  { %1614 = vmatprep.subr.bf16.mxu0 %v1777_v38 }
 0x217   :  { %1615 = vmatpush3.bf16.msra.mxu0 %v1734_v31 }
 0x218   :  { %1616 = vmatprep.subr.bf16.mxu0 %v1777_v38 }
 0x21b   :  { %1617 = vmatpush3.bf16.msra.mxu0 %v1735_v32 }
 0x21c   :  { %1618 = vmatprep.subr.bf16.mxu0 %v1777_v38 }
 0x21f   :  { %1619 = vmatpush3.bf16.msra.mxu0 %v1736_v33 }
 0x2c2   :  { %v890_v12 = vpop.f32.mrf.mxu0 }
 0x2c3   :  { %v891_v13 = vadd.f32 %v1380_v11, %v890_v12 }
 0x2c4   :  { %v1582_v14 = vpop.f32.mrf.mxu0 }
 0x2c5   :  { %v897_v15 = vmul.f32 0.5, %v891_v13 }
 0x2c6   :  { %v893_v16 = vpop.f32.mrf.mxu0 }
 0x2c7   :  { %1753 = vtanh.f32 %v897_v15  ;;  %v894_v17 = vadd.f32 %v1380_v11, %v893_v16 }
 0x2c8   :  { %v1583_v18 = vpop.f32.mrf.mxu0 }
 0x2c9   :  { %v898_v19 = vmul.f32 0.5, %v894_v17 }
 0x2cb   :  { %1755 = vtanh.f32 %v898_v19  ;;  %v1268_v19 = vlaneseq }
 0x2d4   :  { %v1754_v20 = vpop.eup %1753 }
 0x2d5   :  { %v901_v21 = vadd.f32 1.0, %v1754_v20  ;;  %v1269_v20 = vand.u32 127, %v1268_v19 }
 0x2d7   :  { %v903_v24 = vmul.f32 0.5, %v901_v21  ;;  %vm1270_vm2 = vcmp.lt.s32.totalorder %v1269_v20, 10 }
 0x2d8   :  { %v1756_v22 = vpop.eup %1755 }
 0x2d9   :  { %v902_v23 = vadd.f32 1.0, %v1756_v22 }
 0x2db   :  { %v904_v25 = vmul.f32 0.5, %v902_v23 }
 0x2dd   :  { %v905_v26 = vpack.c.bf16 %v904_v25, %v903_v24 }
 0x2df   :  { %1601 = vmatmul.mubr.bf16.vlgmr.msra.gmra.mxu1 %v905_v26 }
 0x2e0   :  { %1640 = vmatprep.mubr.msk.bf16.mxu1 %vm1778_vm0, %v1777_v38  ;;  %1625 = vmatpush3.bf16.msra.mxu1 %v1737_v34 }
 0x2e1   :  { %1626 = vmatprep.subr.bf16.mxu1 %v1777_v38 }
 0x2e4   :  { %1627 = vmatpush3.bf16.msra.mxu1 %v1738_v52 }
 0x2e5   :  { %1628 = vmatprep.subr.bf16.mxu1 %v1777_v38 }
 0x2e8   :  { %1629 = vmatpush3.bf16.msra.mxu1 %v1739_v53 }
 0x2e9   :  { %1630 = vmatprep.subr.bf16.mxu1 %v1777_v38 }
 0x2ec   :  { %1631 = vmatpush3.bf16.msra.mxu1 %v1740_v54 }
 0x2ed   :  { %1632 = vmatprep.subr.bf16.mxu1 %v1777_v38 }
 0x2f0   :  { %1633 = vmatpush3.bf16.msra.mxu1 %v1741_v55 }
 0x2f1   :  { %1634 = vmatprep.subr.bf16.mxu1 %v1777_v38 }
 0x2f4   :  { %1635 = vmatpush3.bf16.msra.mxu1 %v1742_v56 }
 0x2f5   :  { %1636 = vmatprep.subr.bf16.mxu1 %v1777_v38 }
 0x2f8   :  { %1637 = vmatpush3.bf16.msra.mxu1 %v1743_v57 }
 0x2f9   :  { %1638 = vmatprep.subr.bf16.mxu1 %v1777_v38 }
 0x2fc   :  { %1639 = vmatpush3.bf16.msra.mxu1 %v1744_v58 }
 0x39f   :  { %v1011_v36 = vpop.f32.mrf.mxu1 }
 0x3a0   :  { %v1012_v37 = vadd.f32 %v1389_v35, %v1011_v36 }
 0x3a1   :  { %v1602_v39 = vpop.f32.mrf.mxu1 }
 0x3a2   :  { %v1018_v40 = vmul.f32 0.5, %v1012_v37 }
 0x3a3   :  { %v1014_v41 = vpop.f32.mrf.mxu1 }
 0x3a4   :  { %1757 = vtanh.f32 %v1018_v40  ;;  %v1015_v42 = vadd.f32 %v1389_v35, %v1014_v41 }
 0x3a5   :  { %v1603_v43 = vpop.f32.mrf.mxu1 }
 0x3a6   :  { %v1019_v44 = vmul.f32 0.5, %v1015_v42 }
 0x3a8   :  { %1759 = vtanh.f32 %v1019_v44 }
 0x3b1   :  { %v1758_v45 = vpop.eup %1757 }
 0x3b2   :  { %v1022_v46 = vadd.f32 1.0, %v1758_v45 }
 0x3b4   :  { %v1024_v49 = vmul.f32 0.5, %v1022_v46 }
 0x3b5   :  { %v1760_v47 = vpop.eup %1759 }
 0x3b6   :  { %v1023_v48 = vadd.f32 1.0, %v1760_v47 }
 0x3b8   :  { %v1025_v50 = vmul.f32 0.5, %v1023_v48 }
 0x3ba   :  { %v1026_v51 = vpack.c.bf16 %v1025_v50, %v1024_v49 }
 0x3bc   :  { %1621 = vmatmul.mubr.bf16.vlgmr.msra.gmra.mxu0 %v1026_v51 }
 0x47c   :  { %v1132_v60 = vpop.f32.mrf.mxu0 }
 0x47d   :  { %v1133_v61 = vadd.f32 %v1398_v59, %v1132_v60 }
 0x47e   :  { %v1622_v62 = vpop.f32.mrf.mxu0 }
 0x47f   :  { %v1139_v63 = vmul.f32 0.5, %v1133_v61 }
 0x480   :  { %v1135_v0 = vpop.f32.mrf.mxu0 }
 0x481   :  { %1761 = vtanh.f32 %v1139_v63  ;;  %v1136_v1 = vadd.f32 %v1398_v59, %v1135_v0 }
 0x482   :  { %v1623_v2 = vpop.f32.mrf.mxu0 }
 0x483   :  { %v1140_v3 = vmul.f32 0.5, %v1136_v1 }
 0x485   :  { %1763 = vtanh.f32 %v1140_v3 }
 0x48e   :  { %v1762_v38 = vpop.eup %1761 }
 0x48f   :  { %v1143_v4 = vadd.f32 1.0, %v1762_v38 }
 0x491   :  { %v1145_v7 = vmul.f32 0.5, %v1143_v4 }
 0x492   :  { %v1764_v5 = vpop.eup %1763 }
 0x493   :  { %v1144_v6 = vadd.f32 1.0, %v1764_v5 }
 0x495   :  { %v1146_v8 = vmul.f32 0.5, %v1144_v6 }
 0x497   :  { %v1147_v9 = vpack.c.bf16 %v1146_v8, %v1145_v7 }
 0x499   :  { %1641 = vmatmul.mubr.bf16.vlgmr.msra.gmra.mxu1 %v1147_v9 }
 0x559   :  { %v1253_v11 = vpop.f32.mrf.mxu1 }
 0x55a   :  { %v1254_v12 = vadd.f32 %v1407_v10, %v1253_v11 }
 0x55b   :  { %v1642_v13 = vpop.f32.mrf.mxu1 }
 0x55c   :  { %v1260_v14 = vmul.f32 0.5, %v1254_v12 }
 0x55d   :  { %v1256_v15 = vpop.f32.mrf.mxu1 }
 0x55e   :  { %1765 = vtanh.f32 %v1260_v14  ;;  %v1257_v16 = vadd.f32 %v1407_v10, %v1256_v15 }
 0x55f   :  { %v1643_v17 = vpop.f32.mrf.mxu1 }
 0x560   :  { %v1261_v18 = vmul.f32 0.5, %v1257_v16 }
 0x562   :  { %1767 = vtanh.f32 %v1261_v18 }
 0x56b   :  { %v1766_v21 = vpop.eup %1765 }
 0x56c   :  { %v1264_v22 = vadd.f32 1.0, %v1766_v21 }
 0x56e   :  { %v1266_v23 = vmul.f32 0.5, %v1264_v22 }
 0x56f   :  { %v1768_v24 = vpop.eup %1767 }
 0x570   :  { %v1273_v25 = vsel %vm1270_vm2, %v1266_v23, -1e+30  ;;  %v1265_v26 = vadd.f32 1.0, %v1768_v24 }
 0x571   :  { %1275 = vmax.xlane.f32.xlu0 %v1273_v25 }
 0x572   :  { %v1267_v27 = vmul.f32 0.5, %v1265_v26 }
 0x574   :  { %v1274_v28 = vsel %vm1270_vm2, %v1267_v27, -1e+30 }
 0x575   :  { %1277 = vmax.xlane.f32.xlu0 %v1274_v28 }
 0x5fa   :  { %v1276_v29 = vpop.xlane.xlu0 %1275 }
 0x5fb   :  { %v1279_v30 = vsub.f32 %v1266_v23, %v1276_v29 }
 0x5fd   :  { %v1281_v31 = vmul.f32 1.442695, %v1279_v30 }
 0x5fe   :  { %v1278_v32 = vpop.xlane.xlu0 %1277 }
 0x5ff   :  { %1769 = vpow2.f32 %v1281_v31  ;;  %v1280_v33 = vsub.f32 %v1267_v27, %v1278_v32 }
 0x601   :  { %v1283_v34 = vmul.f32 1.442695, %v1280_v33 }
 0x603   :  { %1771 = vpow2.f32 %v1283_v34 }
 0x60c   :  { %v1770_v35 = vpop.eup %1769 }
 0x60d   :  { %v1285_v36 = vsel %vm1270_vm2, %v1770_v35, 0.0 }
 0x60e   :  { %1287 = vadd.xlane.f32.xlu1 %v1285_v36 }
 0x610   :  { %v1772_v37 = vpop.eup %1771 }
 0x611   :  { %v1286_v39 = vsel %vm1270_vm2, %v1772_v37, 0.0 }
 0x612   :  { %1289 = vadd.xlane.f32.xlu1 %v1286_v39 }
 0x697   :  { %v1288_v40 = vpop.xlane.xlu1 %1287 }
 0x698   :  { %1773 = vlog2.f32 %v1288_v40 }
 0x69b   :  { %v1290_v41 = vpop.xlane.xlu1 %1289 }
 0x69c   :  { %1775 = vlog2.f32 %v1290_v41 }
 0x6a5   :  { %v1774_v42 = vpop.eup %1773 }
 0x6a6   :  { %v1292_v43 = vmul.f32 0.6931472, %v1774_v42 }
 0x6a8   :  { %v1295_v45 = vsub.f32 %v1279_v30, %v1292_v43 }
 0x6a9   :  { %v1776_v44 = vpop.eup %1775 }
 0x6aa   :  { %v1294_v46 = vmul.f32 0.6931472, %v1776_v44  ;;  %v1297_v48 = vsel %vm1270_vm2, %v1295_v45, 0.0 }
 0x6ac   :  { %v1296_v47 = vsub.f32 %v1280_v33, %v1294_v46 }
 0x6ae   :  { %v1298_v49 = vsel %vm1270_vm2, %v1296_v47, 0.0 }
 0x6af   :  { %v1423_v50 = vpack.c.bf16 %v1298_v49, %v1297_v48 }
 0x6b1   :  { %1424 = vst [vmem:[%s2230_s13] sm:$0xff] %v1423_v50  }

</bundles_post_ra>
